<compile_context>
chip_gen: v7x
topology: tpu7x:2x2x1
jax: 0.10.0
libtpu: 0.0.40
codegen_flags: <defaults>
</compile_context>

<pallas_src>
import jax
import jax.numpy as jnp
from jax.experimental import pallas as pl
from jax.experimental.pallas import tpu as pltpu

# ----------------------------- static model dims ----------------------------
B = 2          # folded leading dim (envs; == T*B of the rlpyt-style module)
N = 32         # points per cloud
S = 4          # group size (points per token)
G = N // S     # number of groups / tokens per env
BG = B * G     # batch folded into rows
C_PAD = 8      # xyz lane-padded to 8 so coordinate contractions hit the MXU
H_TOK = 32     # mini-PointNet hidden width
D = 32         # encoder.dim (token / encoder feature width)
H_MLP = 64     # transformer MLP hidden width
H_PI = 32      # pi head hidden width
A = 4          # number of discrete actions
H_V = 32       # value head hidden width
EPS = 1e-5     # layer-norm epsilon (PyTorch default)

# TODO(synk): the real Tokenizer uses farthest-point-sampling + kNN grouping
# (data-dependent gather); here groups are contiguous chunks of S points.


# ------------------------- packed parameter slab layout ----------------------
def _rup8(n):
    return (n + 7) // 8 * 8


_W_SHAPES = [                      # (name, rows, cols); row offsets padded to x8
    ("tok_w1", 3, H_TOK),
    ("pos_w1", 3, D),
    ("tok_w2", H_TOK, D),
    ("pos_w2", D, D),
    ("wqkv", D, 3 * D),            # fused [wq | wk | wv]
    ("wo", D, D),
    ("mlp_w1", D, H_MLP),
    ("mlp_w2", H_MLP, D),
    ("head_w1", D, H_PI + H_V),    # fused [pi_w1 | v_w1]
    ("head_w2", H_PI + H_V, A + 1),  # block-diag [pi_w2 ; v_w2]
]
_W_DIMS = {n: (r, c) for n, r, c in _W_SHAPES}
_W_OFFS = {}
_off = 0
for _n, _r, _c in _W_SHAPES:
    _W_OFFS[_n] = _off
    _off += _rup8(_r)
W_ROWS = _off                      # 336 rows (bf16 slab: 86 KiB)
W_COLS = 128                       # lane-padded

_V_SHAPES = [                      # one row per bias / layer-norm vector (f32)
    ("tok_b1", H_TOK), ("tok_b2", D), ("pos_b1", D), ("pos_b2", D),
    ("ln1_g", D), ("ln1_b", D), ("ln2_g", D), ("ln2_b", D),
    ("lnf_g", D), ("lnf_b", D),
    ("mlp_b1", H_MLP), ("mlp_b2", D),
    ("head_b1", H_PI + H_V), ("head_b2", A + 1),
]
_V_DIMS = {n: c for n, c in _V_SHAPES}
_V_IDX = {n: i for i, (n, _) in enumerate(_V_SHAPES)}
V_ROWS = _rup8(len(_V_SHAPES))     # 16 rows
V_COLS = 128

OUT_ROWS = _rup8(B)                # lane/sublane-dense output slab
OUT_COLS = 128


# -------------------------- in-kernel slab accessors -------------------------
def _w(ref, name):
    r, c = _W_DIMS[name]
    o = _W_OFFS[name]
    return ref[o:o + r, 0:c]


def _w8(ref, name):
    # Row-padded view (padding rows are zero in the slab) so K matches the
    # 8-lane-padded coordinate operand and the contraction runs on the MXU.
    r, c = _W_DIMS[name]
    o = _W_OFFS[name]
    return ref[o:o + _rup8(r), 0:c]


def _vrow(ref, name):
    c = _V_DIMS[name]
    i = _V_IDX[name]
    return ref[i:i + 1, 0:c]


def _layer_norm(x, g, b):
    # var = E[x^2] - mu^2: both lane reductions issue from one pass over x.
    mu = jnp.mean(x, axis=-1, keepdims=True)
    ms = jnp.mean(x * x, axis=-1, keepdims=True)
    var = ms - mu * mu
    return (x - mu) * jax.lax.rsqrt(var + EPS) * g + b


# ------------------------------- fused kernel --------------------------------
def _fused_kernel(pos_ref, w_ref, v_ref, out_ref):
    f32, bf16 = jnp.float32, jnp.bfloat16
    # pos_ref: (S*BG, 8), rows ordered s-major: row = s*BG + (b*G + g); cols 3..7 zero.
    P = pos_ref[...]

    # ---- group centers: mean over S aligned 16-row slices (f32 VPU) --------
    ctr = P[0:BG, :]
    for s in range(1, S):
        ctr = ctr + P[s * BG:(s + 1) * BG, :]
    ctr = ctr * (1.0 / S)                                     # (BG, 8)

    # ---- tokenizer: rel@W == P@W - ctr@W (no rel tile, no center broadcast) -
    tw1 = _w8(w_ref, "tok_w1")                                # (8, H_TOK) bf16
    pw = jnp.dot(P.astype(bf16), tw1, preferred_element_type=f32)    # (S*BG, H_TOK)
    cw = jnp.dot(ctr.astype(bf16), tw1, preferred_element_type=f32)  # (BG, H_TOK)
    b1 = _vrow(v_ref, "tok_b1")
    tw2 = _w(w_ref, "tok_w2")
    tok = None
    for s in range(S):                         # S independent back-to-back matmuls
        h_s = jnp.maximum(pw[s * BG:(s + 1) * BG, :] - cw + b1, 0.0)
        f_s = jnp.dot(h_s.astype(bf16), tw2, preferred_element_type=f32)
        tok = f_s if tok is None else jnp.maximum(tok, f_s)   # mini-PointNet max
    tok = tok + _vrow(v_ref, "tok_b2")                        # (BG, D)

    # ---- encoder positional embedding --------------------------------------
    pw1 = _w8(w_ref, "pos_w1")                                # (8, D) bf16
    pe = jnp.maximum(jnp.dot(ctr.astype(bf16), pw1, preferred_element_type=f32)
                     + _vrow(v_ref, "pos_b1"), 0.0)
    pe = jnp.dot(pe.astype(bf16), _w(w_ref, "pos_w2"),
                 preferred_element_type=f32) + _vrow(v_ref, "pos_b2")
    x = tok + pe                                              # (BG, D)

    # ---- pre-norm single-head self-attention (block-diagonal env mask) -----
    n1 = _layer_norm(x, _vrow(v_ref, "ln1_g"), _vrow(v_ref, "ln1_b"))
    qkv = jnp.dot(n1.astype(bf16), _w(w_ref, "wqkv"), preferred_element_type=f32)
    q, k, v = qkv[:, 0:D], qkv[:, D:2 * D], qkv[:, 2 * D:3 * D]

    scores = jax.lax.dot_general(q, k, (((1,), (1,)), ((), ())),
                                 preferred_element_type=f32) * (D ** -0.5)
    r = jax.lax.broadcasted_iota(jnp.int32, (BG, BG), 0)
    c = jax.lax.broadcasted_iota(jnp.int32, (BG, BG), 1)
    if (G & (G - 1)) == 0:                                    # G power of two: shift, no int div
        sh = G.bit_length() - 1
        same_env = (r >> sh) == (c >> sh)
    else:
        same_env = (r // G) == (c // G)
    scores = jnp.where(same_env, scores, -1e9)                # keep attention per-env
    scores = scores - jnp.max(scores, axis=-1, keepdims=True)
    p_att = jnp.exp(scores)
    inv_l = pl.reciprocal(jnp.sum(p_att, axis=-1, keepdims=True), approx=True)
    attn = jnp.dot(p_att, v, preferred_element_type=f32) * inv_l
    x = x + jnp.dot(attn.astype(bf16), _w(w_ref, "wo"), preferred_element_type=f32)

    # ---- pre-norm MLP -------------------------------------------------------
    n2 = _layer_norm(x, _vrow(v_ref, "ln2_g"), _vrow(v_ref, "ln2_b"))
    m = jnp.maximum(jnp.dot(n2.astype(bf16), _w(w_ref, "mlp_w1"),
                            preferred_element_type=f32) + _vrow(v_ref, "mlp_b1"), 0.0)
    x = x + jnp.dot(m.astype(bf16), _w(w_ref, "mlp_w2"),
                    preferred_element_type=f32) + _vrow(v_ref, "mlp_b2")

    # ---- final norm + per-env max-pool over tokens -> (B, D) feature --------
    hf = _layer_norm(x, _vrow(v_ref, "lnf_g"), _vrow(v_ref, "lnf_b"))
    feat = jnp.concatenate(
        [jnp.max(hf[b * G:(b + 1) * G, :], axis=0, keepdims=True)
         for b in range(B)], axis=0)                          # (B, D)

    # ---- fused pi / value heads ---------------------------------------------
    hid = jnp.maximum(jnp.dot(feat.astype(bf16), _w(w_ref, "head_w1"),
                              preferred_element_type=f32)
                      + _vrow(v_ref, "head_b1"), 0.0)         # (B, H_PI + H_V)
    o = jnp.dot(hid.astype(bf16), _w(w_ref, "head_w2"),
                preferred_element_type=f32) + _vrow(v_ref, "head_b2")
    logits = o[:, 0:A]
    value = o[:, A:A + 1]
    logits = logits - jnp.max(logits, axis=-1, keepdims=True)
    e = jnp.exp(logits)
    probs = e / jnp.sum(e, axis=-1, keepdims=True)            # exact: probs sum to 1

    # lane-dense (OUT_ROWS, 128) slab -> single unmasked store
    row = jnp.concatenate(
        [probs, value, jnp.zeros((B, OUT_COLS - (A + 1)), f32)], axis=1)
    out_ref[...] = jnp.concatenate(
        [row, jnp.zeros((OUT_ROWS - B, OUT_COLS), f32)], axis=0)


# ------------------------ wrapper-side layout plumbing ------------------------
def pack_params(p):
    """Fuse qkv & heads and pack weights into one bf16 slab + biases/LN in f32."""
    mats = {
        "tok_w1": p["tok_w1"], "pos_w1": p["pos_w1"],
        "tok_w2": p["tok_w2"], "pos_w2": p["pos_w2"],
        "wqkv": jnp.concatenate([p["wq"], p["wk"], p["wv"]], axis=1),
        "wo": p["wo"],
        "mlp_w1": p["mlp_w1"], "mlp_w2": p["mlp_w2"],
        "head_w1": jnp.concatenate([p["pi_w1"], p["v_w1"]], axis=1),
        "head_w2": (jnp.zeros((H_PI + H_V, A + 1), jnp.float32)
                    .at[:H_PI, :A].set(p["pi_w2"])
                    .at[H_PI:, A:].set(p["v_w2"])),
    }
    w_slab = jnp.zeros((W_ROWS, W_COLS), jnp.float32)
    for name, r, c in _W_SHAPES:
        o = _W_OFFS[name]
        w_slab = w_slab.at[o:o + r, 0:c].set(mats[name])
    w_slab = w_slab.astype(jnp.bfloat16)          # halve the dominant DMA

    vecs = {
        "tok_b1": p["tok_b1"], "tok_b2": p["tok_b2"],
        "pos_b1": p["pos_b1"], "pos_b2": p["pos_b2"],
        "ln1_g": p["ln1_g"], "ln1_b": p["ln1_b"],
        "ln2_g": p["ln2_g"], "ln2_b": p["ln2_b"],
        "lnf_g": p["lnf_g"], "lnf_b": p["lnf_b"],
        "mlp_b1": p["mlp_b1"], "mlp_b2": p["mlp_b2"],
        "head_b1": jnp.concatenate([p["pi_b1"], p["v_b1"]], axis=1),
        "head_b2": jnp.concatenate([p["pi_b2"], p["v_b2"]], axis=1),
    }
    v_slab = jnp.zeros((V_ROWS, V_COLS), jnp.float32)
    for name, c in _V_SHAPES:
        i = _V_IDX[name]
        v_slab = v_slab.at[i:i + 1, 0:c].set(vecs[name].reshape(1, c))
    return w_slab, v_slab


def categorical_pg_forward(pos, w_slab, v_slab):
    # pos: [B, N, 3]. B is the folded env/timestep dim; growing it (fold T*B
    # into these rows) is the main throughput lever — the single launch and the
    # weight-slab DMA amortize, rows just get taller.
    # TODO(synk): for very large B add a leading "parallel" grid axis over env
    # chunks (and per-env blocked attention) to shard across v7x's two cores.
    pos_pad = jnp.concatenate(
        [pos.astype(jnp.float32),
         jnp.zeros(pos.shape[:-1] + (C_PAD - 3,), jnp.float32)], axis=-1)
    # rows rearranged s-major so every in-kernel group reduction is an aligned
    # 16-row sublane slice.
    pos_rows = pos_pad.reshape(B, G, S, C_PAD).transpose(2, 0, 1, 3).reshape(S * BG, C_PAD)

    out = pl.pallas_call(
        _fused_kernel,
        out_shape=jax.ShapeDtypeStruct((OUT_ROWS, OUT_COLS), jnp.float32),
        grid_spec=pltpu.PrefetchScalarGridSpec(
            num_scalar_prefetch=0,
            grid=(1,),
            in_specs=[
                pl.BlockSpec((S * BG, C_PAD), lambda i: (0, 0)),
                pl.BlockSpec((W_ROWS, W_COLS), lambda i: (0, 0)),
                pl.BlockSpec((V_ROWS, V_COLS), lambda i: (0, 0)),
            ],
            out_specs=pl.BlockSpec((OUT_ROWS, OUT_COLS), lambda i: (0, 0)),
        ),
        compiler_params=pltpu.CompilerParams(
            dimension_semantics=("arbitrary",)),
    )(pos_rows, w_slab, v_slab)

    probs = out[:B, 0:A]
    value = out[:B, A]
    # infer_leading_dims / restore_leading_dims: lead_dim=1, T=1 -> identity.
    return {"dist_params": {"probs": probs}, "value": value}


# ----------------------------- params & reference ----------------------------
def init_params(key):
    names = ["tok_w1", "tok_w2", "pos_w1", "pos_w2", "wq", "wk", "wv", "wo",
             "mlp_w1", "mlp_w2", "pi_w1", "pi_w2", "v_w1", "v_w2"]
    shapes = [(3, H_TOK), (H_TOK, D), (3, D), (D, D), (D, D), (D, D), (D, D),
              (D, D), (D, H_MLP), (H_MLP, D), (D, H_PI), (H_PI, A),
              (D, H_V), (H_V, 1)]
    keys = jax.random.split(key, len(names))
    p = {n: 0.05 * jax.random.normal(k, s, jnp.float32)
         for n, s, k in zip(names, shapes, keys)}
    zeros = lambda s: jnp.zeros(s, jnp.float32)
    ones = lambda s: jnp.ones(s, jnp.float32)
    p.update(tok_b1=zeros((1, H_TOK)), tok_b2=zeros((1, D)),
             pos_b1=zeros((1, D)), pos_b2=zeros((1, D)),
             mlp_b1=zeros((1, H_MLP)), mlp_b2=zeros((1, D)),
             pi_b1=zeros((1, H_PI)), pi_b2=zeros((1, A)),
             v_b1=zeros((1, H_V)), v_b2=zeros((1, 1)),
             ln1_g=ones((1, D)), ln1_b=zeros((1, D)),
             ln2_g=ones((1, D)), ln2_b=zeros((1, D)),
             lnf_g=ones((1, D)), lnf_b=zeros((1, D)))
    return p


def reference_forward(pos, p):
    pts = pos.reshape(B, G, S, 3)
    ctr = pts.mean(axis=2)
    rel = pts - ctr[:, :, None, :]
    h = jnp.maximum(rel.reshape(B, G * S, 3) @ p["tok_w1"] + p["tok_b1"], 0.0)
    f = h @ p["tok_w2"] + p["tok_b2"]
    tok = f.reshape(B, G, S, D).max(axis=2)
    pe = jnp.maximum(ctr @ p["pos_w1"] + p["pos_b1"], 0.0) @ p["pos_w2"] + p["pos_b2"]
    hh = tok + pe

    def ln(v, g, b):
        mu = v.mean(-1, keepdims=True)
        var = ((v - mu) ** 2).mean(-1, keepdims=True)
        return (v - mu) * jax.lax.rsqrt(var + EPS) * g + b

    n1 = ln(hh, p["ln1_g"], p["ln1_b"])
    q, k, v = n1 @ p["wq"], n1 @ p["wk"], n1 @ p["wv"]
    s = jnp.einsum("bqd,bkd->bqk", q, k) * (D ** -0.5)
    a = jax.nn.softmax(s, axis=-1)
    hh = hh + jnp.einsum("bqk,bkd->bqd", a, v) @ p["wo"]
    n2 = ln(hh, p["ln2_g"], p["ln2_b"])
    hh = hh + jnp.maximum(n2 @ p["mlp_w1"] + p["mlp_b1"], 0.0) @ p["mlp_w2"] + p["mlp_b2"]
    feat = ln(hh, p["lnf_g"], p["lnf_b"]).max(axis=1)
    logits = jnp.maximum(feat @ p["pi_w1"] + p["pi_b1"], 0.0) @ p["pi_w2"] + p["pi_b2"]
    probs = jax.nn.softmax(logits, axis=-1)
    value = (jnp.maximum(feat @ p["v_w1"] + p["v_b1"], 0.0) @ p["v_w2"] + p["v_b2"])[:, 0]
    return probs, value


# ----------------------------------- main ------------------------------------
if __name__ == "__main__":
    key = jax.random.PRNGKey(0)
    k_param, k_pos = jax.random.split(key)
    params = init_params(k_param)
    pos = jax.random.normal(k_pos, (B, N, 3), jnp.float32)

    w_slab, v_slab = pack_params(params)     # one-time weight layout plumbing
    fwd = jax.jit(categorical_pg_forward)
    out = jax.block_until_ready(fwd(pos, w_slab, v_slab))
    probs, value = out["dist_params"]["probs"], out["value"]

    ref_probs, ref_value = reference_forward(pos, params)
    assert probs.shape == (B, A) and value.shape == (B,)
    # bf16 weight matmuls (f32 accumulation) + EUP approx reciprocal in the
    # attention softmax: compare against the pure-f32 reference at 2e-3.
    assert float(jnp.max(jnp.abs(probs - ref_probs))) < 2e-3
    assert float(jnp.max(jnp.abs(value - ref_value))) < 2e-3
    assert float(jnp.max(jnp.abs(probs.sum(-1) - 1.0))) < 1e-4

    print("KERNEL_OK")
</pallas_src>

<mosaic_0001>
module attributes {stable_mosaic.version = 11 : i64} {
  func.func @_fused_kernel(%arg0: i32, %arg1: memref<64x8xf32, #tpu.memory_space<vmem>>, %arg2: memref<336x128xbf16, #tpu.memory_space<vmem>>, %arg3: memref<16x128xf32, #tpu.memory_space<vmem>>, %arg4: memref<8x128xf32, #tpu.memory_space<vmem>>) attributes {dimension_semantics = [#tpu.dimension_semantics<arbitrary>], iteration_bounds = array<i64: 1>, scalar_prefetch = 0 : i64, scratch_operands = 0 : i64, tpu.core_type = #tpu.core_type<tc>, window_params = [{pipeline_mode = #tpu.pipeline_mode<synchronous>, transform_indices = @transform_0, window_bounds = array<i64: 64, 8>}, {pipeline_mode = #tpu.pipeline_mode<synchronous>, transform_indices = @transform_1, window_bounds = array<i64: 336, 128>}, {pipeline_mode = #tpu.pipeline_mode<synchronous>, transform_indices = @transform_2, window_bounds = array<i64: 16, 128>}, {pipeline_mode = #tpu.pipeline_mode<synchronous>, transform_indices = @transform_3, window_bounds = array<i64: 8, 128>}]} {
    %c0 = arith.constant 0 : index
    %c0_0 = arith.constant 0 : index
    %0 = vector.load %arg1[%c0, %c0_0] : memref<64x8xf32, #tpu.memory_space<vmem>>, vector<64x8xf32>
    %1 = vector.extract_strided_slice %0 {offsets = [0, 0], sizes = [16, 8], strides = [1, 1]} : vector<64x8xf32> to vector<16x8xf32>
    %2 = vector.extract_strided_slice %0 {offsets = [16, 0], sizes = [16, 8], strides = [1, 1]} : vector<64x8xf32> to vector<16x8xf32>
    %3 = arith.addf %1, %2 : vector<16x8xf32>
    %4 = vector.extract_strided_slice %0 {offsets = [32, 0], sizes = [16, 8], strides = [1, 1]} : vector<64x8xf32> to vector<16x8xf32>
    %5 = arith.addf %3, %4 : vector<16x8xf32>
    %6 = vector.extract_strided_slice %0 {offsets = [48, 0], sizes = [16, 8], strides = [1, 1]} : vector<64x8xf32> to vector<16x8xf32>
    %7 = arith.addf %5, %6 : vector<16x8xf32>
    %cst = arith.constant 2.500000e-01 : f32
    %8 = vector.broadcast %cst : f32 to vector<16x8xf32>
    %9 = arith.mulf %7, %8 : vector<16x8xf32>
    %c0_1 = arith.constant 0 : index
    %c0_2 = arith.constant 0 : index
    %10 = vector.load %arg2[%c0_1, %c0_2] : memref<336x128xbf16, #tpu.memory_space<vmem>>, vector<8x32xbf16>
    %11 = arith.truncf %0 : vector<64x8xf32> to vector<64x8xbf16>
    %cst_3 = arith.constant dense<0.000000e+00> : vector<64x32xf32>
    %12 = tpu.matmul %11, %10, %cst_3 {dimension_numbers = #tpu.dot_dimension_numbers<[1], [0], [0], [1], [0, 0, 1, 1], [], []>} : vector<64x8xbf16>, vector<8x32xbf16>, vector<64x32xf32> -> vector<64x32xf32>
    %13 = arith.truncf %9 : vector<16x8xf32> to vector<16x8xbf16>
    %cst_4 = arith.constant dense<0.000000e+00> : vector<16x32xf32>
    %14 = tpu.matmul %13, %10, %cst_4 {dimension_numbers = #tpu.dot_dimension_numbers<[1], [0], [0], [1], [0, 0, 1, 1], [], []>} : vector<16x8xbf16>, vector<8x32xbf16>, vector<16x32xf32> -> vector<16x32xf32>
    %c0_5 = arith.constant 0 : index
    %c0_6 = arith.constant 0 : index
    %15 = vector.load %arg3[%c0_5, %c0_6] : memref<16x128xf32, #tpu.memory_space<vmem>>, vector<1x32xf32>
    %c16 = arith.constant 16 : index
    %c0_7 = arith.constant 0 : index
    %16 = vector.load %arg2[%c16, %c0_7] : memref<336x128xbf16, #tpu.memory_space<vmem>>, vector<32x32xbf16>
    %17 = vector.extract_strided_slice %12 {offsets = [0, 0], sizes = [16, 32], strides = [1, 1]} : vector<64x32xf32> to vector<16x32xf32>
    %18 = arith.subf %17, %14 : vector<16x32xf32>
    %19 = vector.broadcast %15 : vector<1x32xf32> to vector<16x32xf32>
    %20 = arith.addf %18, %19 : vector<16x32xf32>
    %cst_8 = arith.constant 0.000000e+00 : f32
    %21 = vector.broadcast %cst_8 : f32 to vector<16x32xf32>
    %22 = arith.maximumf %20, %21 : vector<16x32xf32>
    %23 = arith.truncf %22 : vector<16x32xf32> to vector<16x32xbf16>
    %cst_9 = arith.constant dense<0.000000e+00> : vector<16x32xf32>
    %24 = tpu.matmul %23, %16, %cst_9 {dimension_numbers = #tpu.dot_dimension_numbers<[1], [0], [0], [1], [0, 0, 1, 1], [], []>} : vector<16x32xbf16>, vector<32x32xbf16>, vector<16x32xf32> -> vector<16x32xf32>
    %25 = vector.extract_strided_slice %12 {offsets = [16, 0], sizes = [16, 32], strides = [1, 1]} : vector<64x32xf32> to vector<16x32xf32>
    %26 = arith.subf %25, %14 : vector<16x32xf32>
    %27 = vector.broadcast %15 : vector<1x32xf32> to vector<16x32xf32>
    %28 = arith.addf %26, %27 : vector<16x32xf32>
    %cst_10 = arith.constant 0.000000e+00 : f32
    %29 = vector.broadcast %cst_10 : f32 to vector<16x32xf32>
    %30 = arith.maximumf %28, %29 : vector<16x32xf32>
    %31 = arith.truncf %30 : vector<16x32xf32> to vector<16x32xbf16>
    %cst_11 = arith.constant dense<0.000000e+00> : vector<16x32xf32>
    %32 = tpu.matmul %31, %16, %cst_11 {dimension_numbers = #tpu.dot_dimension_numbers<[1], [0], [0], [1], [0, 0, 1, 1], [], []>} : vector<16x32xbf16>, vector<32x32xbf16>, vector<16x32xf32> -> vector<16x32xf32>
    %33 = arith.maximumf %24, %32 : vector<16x32xf32>
    %34 = vector.extract_strided_slice %12 {offsets = [32, 0], sizes = [16, 32], strides = [1, 1]} : vector<64x32xf32> to vector<16x32xf32>
    %35 = arith.subf %34, %14 : vector<16x32xf32>
    %36 = vector.broadcast %15 : vector<1x32xf32> to vector<16x32xf32>
    %37 = arith.addf %35, %36 : vector<16x32xf32>
    %cst_12 = arith.constant 0.000000e+00 : f32
    %38 = vector.broadcast %cst_12 : f32 to vector<16x32xf32>
    %39 = arith.maximumf %37, %38 : vector<16x32xf32>
    %40 = arith.truncf %39 : vector<16x32xf32> to vector<16x32xbf16>
    %cst_13 = arith.constant dense<0.000000e+00> : vector<16x32xf32>
    %41 = tpu.matmul %40, %16, %cst_13 {dimension_numbers = #tpu.dot_dimension_numbers<[1], [0], [0], [1], [0, 0, 1, 1], [], []>} : vector<16x32xbf16>, vector<32x32xbf16>, vector<16x32xf32> -> vector<16x32xf32>
    %42 = arith.maximumf %33, %41 : vector<16x32xf32>
    %43 = vector.extract_strided_slice %12 {offsets = [48, 0], sizes = [16, 32], strides = [1, 1]} : vector<64x32xf32> to vector<16x32xf32>
    %44 = arith.subf %43, %14 : vector<16x32xf32>
    %45 = vector.broadcast %15 : vector<1x32xf32> to vector<16x32xf32>
    %46 = arith.addf %44, %45 : vector<16x32xf32>
    %cst_14 = arith.constant 0.000000e+00 : f32
    %47 = vector.broadcast %cst_14 : f32 to vector<16x32xf32>
    %48 = arith.maximumf %46, %47 : vector<16x32xf32>
    %49 = arith.truncf %48 : vector<16x32xf32> to vector<16x32xbf16>
    %cst_15 = arith.constant dense<0.000000e+00> : vector<16x32xf32>
    %50 = tpu.matmul %49, %16, %cst_15 {dimension_numbers = #tpu.dot_dimension_numbers<[1], [0], [0], [1], [0, 0, 1, 1], [], []>} : vector<16x32xbf16>, vector<32x32xbf16>, vector<16x32xf32> -> vector<16x32xf32>
    %51 = arith.maximumf %42, %50 : vector<16x32xf32>
    %c1 = arith.constant 1 : index
    %c0_16 = arith.constant 0 : index
    %52 = vector.load %arg3[%c1, %c0_16] : memref<16x128xf32, #tpu.memory_space<vmem>>, vector<1x32xf32>
    %53 = vector.broadcast %52 : vector<1x32xf32> to vector<16x32xf32>
    %54 = arith.addf %51, %53 : vector<16x32xf32>
    %c8 = arith.constant 8 : index
    %c0_17 = arith.constant 0 : index
    %55 = vector.load %arg2[%c8, %c0_17] : memref<336x128xbf16, #tpu.memory_space<vmem>>, vector<8x32xbf16>
    %56 = arith.truncf %9 : vector<16x8xf32> to vector<16x8xbf16>
    %cst_18 = arith.constant dense<0.000000e+00> : vector<16x32xf32>
    %57 = tpu.matmul %56, %55, %cst_18 {dimension_numbers = #tpu.dot_dimension_numbers<[1], [0], [0], [1], [0, 0, 1, 1], [], []>} : vector<16x8xbf16>, vector<8x32xbf16>, vector<16x32xf32> -> vector<16x32xf32>
    %c2 = arith.constant 2 : index
    %c0_19 = arith.constant 0 : index
    %58 = vector.load %arg3[%c2, %c0_19] : memref<16x128xf32, #tpu.memory_space<vmem>>, vector<1x32xf32>
    %59 = vector.broadcast %58 : vector<1x32xf32> to vector<16x32xf32>
    %60 = arith.addf %57, %59 : vector<16x32xf32>
    %cst_20 = arith.constant 0.000000e+00 : f32
    %61 = vector.broadcast %cst_20 : f32 to vector<16x32xf32>
    %62 = arith.maximumf %60, %61 : vector<16x32xf32>
    %63 = arith.truncf %62 : vector<16x32xf32> to vector<16x32xbf16>
    %c48 = arith.constant 48 : index
    %c0_21 = arith.constant 0 : index
    %64 = vector.load %arg2[%c48, %c0_21] : memref<336x128xbf16, #tpu.memory_space<vmem>>, vector<32x32xbf16>
    %cst_22 = arith.constant dense<0.000000e+00> : vector<16x32xf32>
    %65 = tpu.matmul %63, %64, %cst_22 {dimension_numbers = #tpu.dot_dimension_numbers<[1], [0], [0], [1], [0, 0, 1, 1], [], []>} : vector<16x32xbf16>, vector<32x32xbf16>, vector<16x32xf32> -> vector<16x32xf32>
    %c3 = arith.constant 3 : index
    %c0_23 = arith.constant 0 : index
    %66 = vector.load %arg3[%c3, %c0_23] : memref<16x128xf32, #tpu.memory_space<vmem>>, vector<1x32xf32>
    %67 = vector.broadcast %66 : vector<1x32xf32> to vector<16x32xf32>
    %68 = arith.addf %65, %67 : vector<16x32xf32>
    %69 = arith.addf %54, %68 : vector<16x32xf32>
    %c4 = arith.constant 4 : index
    %c0_24 = arith.constant 0 : index
    %70 = vector.load %arg3[%c4, %c0_24] : memref<16x128xf32, #tpu.memory_space<vmem>>, vector<1x32xf32>
    %c5 = arith.constant 5 : index
    %c0_25 = arith.constant 0 : index
    %71 = vector.load %arg3[%c5, %c0_25] : memref<16x128xf32, #tpu.memory_space<vmem>>, vector<1x32xf32>
    %cst_26 = arith.constant dense<0.000000e+00> : vector<16xf32>
    %72 = vector.multi_reduction <add>, %69, %cst_26 [1] : vector<16x32xf32> to vector<16xf32>
    %73 = vector.shape_cast %72 : vector<16xf32> to vector<16x1xf32>
    %cst_27 = arith.constant 3.200000e+01 : f32
    %74 = vector.broadcast %cst_27 : f32 to vector<16x1xf32>
    %75 = arith.divf %73, %74 : vector<16x1xf32>
    %76 = arith.mulf %69, %69 : vector<16x32xf32>
    %cst_28 = arith.constant dense<0.000000e+00> : vector<16xf32>
    %77 = vector.multi_reduction <add>, %76, %cst_28 [1] : vector<16x32xf32> to vector<16xf32>
    %78 = vector.shape_cast %77 : vector<16xf32> to vector<16x1xf32>
    %cst_29 = arith.constant 3.200000e+01 : f32
    %79 = vector.broadcast %cst_29 : f32 to vector<16x1xf32>
    %80 = arith.divf %78, %79 : vector<16x1xf32>
    %81 = arith.mulf %75, %75 : vector<16x1xf32>
    %82 = arith.subf %80, %81 : vector<16x1xf32>
    %83 = vector.broadcast %75 : vector<16x1xf32> to vector<16x32xf32>
    %84 = arith.subf %69, %83 : vector<16x32xf32>
    %cst_30 = arith.constant 9.99999974E-6 : f32
    %85 = vector.broadcast %cst_30 : f32 to vector<16x1xf32>
    %86 = arith.addf %82, %85 : vector<16x1xf32>
    %87 = math.rsqrt %86 : vector<16x1xf32>
    %88 = vector.broadcast %87 : vector<16x1xf32> to vector<16x32xf32>
    %89 = arith.mulf %84, %88 : vector<16x32xf32>
    %90 = vector.broadcast %70 : vector<1x32xf32> to vector<16x32xf32>
    %91 = arith.mulf %89, %90 : vector<16x32xf32>
    %92 = vector.broadcast %71 : vector<1x32xf32> to vector<16x32xf32>
    %93 = arith.addf %91, %92 : vector<16x32xf32>
    %94 = arith.truncf %93 : vector<16x32xf32> to vector<16x32xbf16>
    %c80 = arith.constant 80 : index
    %c0_31 = arith.constant 0 : index
    %95 = vector.load %arg2[%c80, %c0_31] : memref<336x128xbf16, #tpu.memory_space<vmem>>, vector<32x96xbf16>
    %cst_32 = arith.constant dense<0.000000e+00> : vector<16x96xf32>
    %96 = tpu.matmul %94, %95, %cst_32 {dimension_numbers = #tpu.dot_dimension_numbers<[1], [0], [0], [1], [0, 0, 1, 1], [], []>} : vector<16x32xbf16>, vector<32x96xbf16>, vector<16x96xf32> -> vector<16x96xf32>
    %97 = vector.extract_strided_slice %96 {offsets = [0, 0], sizes = [16, 32], strides = [1, 1]} : vector<16x96xf32> to vector<16x32xf32>
    %98 = vector.extract_strided_slice %96 {offsets = [0, 32], sizes = [16, 32], strides = [1, 1]} : vector<16x96xf32> to vector<16x32xf32>
    %99 = vector.extract_strided_slice %96 {offsets = [0, 64], sizes = [16, 32], strides = [1, 1]} : vector<16x96xf32> to vector<16x32xf32>
    %cst_33 = arith.constant dense<0.000000e+00> : vector<16x16xf32>
    %100 = tpu.matmul %97, %98, %cst_33 {dimension_numbers = #tpu.dot_dimension_numbers<[1], [1], [0], [0], [0, 0, 1, 0], [], []>} : vector<16x32xf32>, vector<16x32xf32>, vector<16x16xf32> -> vector<16x16xf32>
    %cst_34 = arith.constant 0.176776692 : f32
    %101 = vector.broadcast %cst_34 : f32 to vector<16x16xf32>
    %102 = arith.mulf %100, %101 : vector<16x16xf32>
    %103 = tpu.iota {dimensions = array<i32: 0>} : vector<16x16xi32>
    %104 = tpu.iota {dimensions = array<i32: 1>} : vector<16x16xi32>
    %c3_i32 = arith.constant 3 : i32
    %105 = vector.broadcast %c3_i32 : i32 to vector<16x16xi32>
    %106 = arith.shrsi %103, %105 : vector<16x16xi32>
    %c3_i32_35 = arith.constant 3 : i32
    %107 = vector.broadcast %c3_i32_35 : i32 to vector<16x16xi32>
    %108 = arith.shrsi %104, %107 : vector<16x16xi32>
    %109 = arith.cmpi eq, %106, %108 : vector<16x16xi32>
    %cst_36 = arith.constant -1.000000e+09 : f32
    %110 = vector.broadcast %cst_36 : f32 to vector<16x16xf32>
    %111 = arith.select %109, %102, %110 : vector<16x16xi1>, vector<16x16xf32>
    %cst_37 = arith.constant dense<0xFF800000> : vector<16xf32>
    %112 = vector.multi_reduction <maximumf>, %111, %cst_37 [1] : vector<16x16xf32> to vector<16xf32>
    %113 = vector.shape_cast %112 : vector<16xf32> to vector<16x1xf32>
    %114 = vector.broadcast %113 : vector<16x1xf32> to vector<16x16xf32>
    %115 = arith.subf %111, %114 : vector<16x16xf32>
    %116 = math.exp %115 : vector<16x16xf32>
    %cst_38 = arith.constant dense<0.000000e+00> : vector<16xf32>
    %117 = vector.multi_reduction <add>, %116, %cst_38 [1] : vector<16x16xf32> to vector<16xf32>
    %118 = vector.shape_cast %117 : vector<16xf32> to vector<16x1xf32>
    %119 = tpu.reciprocal %118 {approx = true} : vector<16x1xf32> -> vector<16x1xf32>
    %cst_39 = arith.constant dense<0.000000e+00> : vector<16x32xf32>
    %120 = tpu.matmul %116, %99, %cst_39 {dimension_numbers = #tpu.dot_dimension_numbers<[1], [0], [0], [1], [0, 0, 1, 1], [], []>} : vector<16x16xf32>, vector<16x32xf32>, vector<16x32xf32> -> vector<16x32xf32>
    %121 = vector.broadcast %119 : vector<16x1xf32> to vector<16x32xf32>
    %122 = arith.mulf %120, %121 : vector<16x32xf32>
    %123 = arith.truncf %122 : vector<16x32xf32> to vector<16x32xbf16>
    %c112 = arith.constant 112 : index
    %c0_40 = arith.constant 0 : index
    %124 = vector.load %arg2[%c112, %c0_40] : memref<336x128xbf16, #tpu.memory_space<vmem>>, vector<32x32xbf16>
    %cst_41 = arith.constant dense<0.000000e+00> : vector<16x32xf32>
    %125 = tpu.matmul %123, %124, %cst_41 {dimension_numbers = #tpu.dot_dimension_numbers<[1], [0], [0], [1], [0, 0, 1, 1], [], []>} : vector<16x32xbf16>, vector<32x32xbf16>, vector<16x32xf32> -> vector<16x32xf32>
    %126 = arith.addf %69, %125 : vector<16x32xf32>
    %c6 = arith.constant 6 : index
    %c0_42 = arith.constant 0 : index
    %127 = vector.load %arg3[%c6, %c0_42] : memref<16x128xf32, #tpu.memory_space<vmem>>, vector<1x32xf32>
    %c7 = arith.constant 7 : index
    %c0_43 = arith.constant 0 : index
    %128 = vector.load %arg3[%c7, %c0_43] : memref<16x128xf32, #tpu.memory_space<vmem>>, vector<1x32xf32>
    %cst_44 = arith.constant dense<0.000000e+00> : vector<16xf32>
    %129 = vector.multi_reduction <add>, %126, %cst_44 [1] : vector<16x32xf32> to vector<16xf32>
    %130 = vector.shape_cast %129 : vector<16xf32> to vector<16x1xf32>
    %cst_45 = arith.constant 3.200000e+01 : f32
    %131 = vector.broadcast %cst_45 : f32 to vector<16x1xf32>
    %132 = arith.divf %130, %131 : vector<16x1xf32>
    %133 = arith.mulf %126, %126 : vector<16x32xf32>
    %cst_46 = arith.constant dense<0.000000e+00> : vector<16xf32>
    %134 = vector.multi_reduction <add>, %133, %cst_46 [1] : vector<16x32xf32> to vector<16xf32>
    %135 = vector.shape_cast %134 : vector<16xf32> to vector<16x1xf32>
    %cst_47 = arith.constant 3.200000e+01 : f32
    %136 = vector.broadcast %cst_47 : f32 to vector<16x1xf32>
    %137 = arith.divf %135, %136 : vector<16x1xf32>
    %138 = arith.mulf %132, %132 : vector<16x1xf32>
    %139 = arith.subf %137, %138 : vector<16x1xf32>
    %140 = vector.broadcast %132 : vector<16x1xf32> to vector<16x32xf32>
    %141 = arith.subf %126, %140 : vector<16x32xf32>
    %cst_48 = arith.constant 9.99999974E-6 : f32
    %142 = vector.broadcast %cst_48 : f32 to vector<16x1xf32>
    %143 = arith.addf %139, %142 : vector<16x1xf32>
    %144 = math.rsqrt %143 : vector<16x1xf32>
    %145 = vector.broadcast %144 : vector<16x1xf32> to vector<16x32xf32>
    %146 = arith.mulf %141, %145 : vector<16x32xf32>
    %147 = vector.broadcast %127 : vector<1x32xf32> to vector<16x32xf32>
    %148 = arith.mulf %146, %147 : vector<16x32xf32>
    %149 = vector.broadcast %128 : vector<1x32xf32> to vector<16x32xf32>
    %150 = arith.addf %148, %149 : vector<16x32xf32>
    %151 = arith.truncf %150 : vector<16x32xf32> to vector<16x32xbf16>
    %c144 = arith.constant 144 : index
    %c0_49 = arith.constant 0 : index
    %152 = vector.load %arg2[%c144, %c0_49] : memref<336x128xbf16, #tpu.memory_space<vmem>>, vector<32x64xbf16>
    %cst_50 = arith.constant dense<0.000000e+00> : vector<16x64xf32>
    %153 = tpu.matmul %151, %152, %cst_50 {dimension_numbers = #tpu.dot_dimension_numbers<[1], [0], [0], [1], [0, 0, 1, 1], [], []>} : vector<16x32xbf16>, vector<32x64xbf16>, vector<16x64xf32> -> vector<16x64xf32>
    %c10 = arith.constant 10 : index
    %c0_51 = arith.constant 0 : index
    %154 = vector.load %arg3[%c10, %c0_51] : memref<16x128xf32, #tpu.memory_space<vmem>>, vector<1x64xf32>
    %155 = vector.broadcast %154 : vector<1x64xf32> to vector<16x64xf32>
    %156 = arith.addf %153, %155 : vector<16x64xf32>
    %cst_52 = arith.constant 0.000000e+00 : f32
    %157 = vector.broadcast %cst_52 : f32 to vector<16x64xf32>
    %158 = arith.maximumf %156, %157 : vector<16x64xf32>
    %159 = arith.truncf %158 : vector<16x64xf32> to vector<16x64xbf16>
    %c176 = arith.constant 176 : index
    %c0_53 = arith.constant 0 : index
    %160 = vector.load %arg2[%c176, %c0_53] : memref<336x128xbf16, #tpu.memory_space<vmem>>, vector<64x32xbf16>
    %cst_54 = arith.constant dense<0.000000e+00> : vector<16x32xf32>
    %161 = tpu.matmul %159, %160, %cst_54 {dimension_numbers = #tpu.dot_dimension_numbers<[1], [0], [0], [1], [0, 0, 1, 1], [], []>} : vector<16x64xbf16>, vector<64x32xbf16>, vector<16x32xf32> -> vector<16x32xf32>
    %162 = arith.addf %126, %161 : vector<16x32xf32>
    %c11 = arith.constant 11 : index
    %c0_55 = arith.constant 0 : index
    %163 = vector.load %arg3[%c11, %c0_55] : memref<16x128xf32, #tpu.memory_space<vmem>>, vector<1x32xf32>
    %164 = vector.broadcast %163 : vector<1x32xf32> to vector<16x32xf32>
    %165 = arith.addf %162, %164 : vector<16x32xf32>
    %c8_56 = arith.constant 8 : index
    %c0_57 = arith.constant 0 : index
    %166 = vector.load %arg3[%c8_56, %c0_57] : memref<16x128xf32, #tpu.memory_space<vmem>>, vector<1x32xf32>
    %c9 = arith.constant 9 : index
    %c0_58 = arith.constant 0 : index
    %167 = vector.load %arg3[%c9, %c0_58] : memref<16x128xf32, #tpu.memory_space<vmem>>, vector<1x32xf32>
    %cst_59 = arith.constant dense<0.000000e+00> : vector<16xf32>
    %168 = vector.multi_reduction <add>, %165, %cst_59 [1] : vector<16x32xf32> to vector<16xf32>
    %169 = vector.shape_cast %168 : vector<16xf32> to vector<16x1xf32>
    %cst_60 = arith.constant 3.200000e+01 : f32
    %170 = vector.broadcast %cst_60 : f32 to vector<16x1xf32>
    %171 = arith.divf %169, %170 : vector<16x1xf32>
    %172 = arith.mulf %165, %165 : vector<16x32xf32>
    %cst_61 = arith.constant dense<0.000000e+00> : vector<16xf32>
    %173 = vector.multi_reduction <add>, %172, %cst_61 [1] : vector<16x32xf32> to vector<16xf32>
    %174 = vector.shape_cast %173 : vector<16xf32> to vector<16x1xf32>
    %cst_62 = arith.constant 3.200000e+01 : f32
    %175 = vector.broadcast %cst_62 : f32 to vector<16x1xf32>
    %176 = arith.divf %174, %175 : vector<16x1xf32>
    %177 = arith.mulf %171, %171 : vector<16x1xf32>
    %178 = arith.subf %176, %177 : vector<16x1xf32>
    %179 = vector.broadcast %171 : vector<16x1xf32> to vector<16x32xf32>
    %180 = arith.subf %165, %179 : vector<16x32xf32>
    %cst_63 = arith.constant 9.99999974E-6 : f32
    %181 = vector.broadcast %cst_63 : f32 to vector<16x1xf32>
    %182 = arith.addf %178, %181 : vector<16x1xf32>
    %183 = math.rsqrt %182 : vector<16x1xf32>
    %184 = vector.broadcast %183 : vector<16x1xf32> to vector<16x32xf32>
    %185 = arith.mulf %180, %184 : vector<16x32xf32>
    %186 = vector.broadcast %166 : vector<1x32xf32> to vector<16x32xf32>
    %187 = arith.mulf %185, %186 : vector<16x32xf32>
    %188 = vector.broadcast %167 : vector<1x32xf32> to vector<16x32xf32>
    %189 = arith.addf %187, %188 : vector<16x32xf32>
    %190 = vector.extract_strided_slice %189 {offsets = [0, 0], sizes = [8, 32], strides = [1, 1]} : vector<16x32xf32> to vector<8x32xf32>
    %cst_64 = arith.constant dense<0xFF800000> : vector<32xf32>
    %191 = vector.multi_reduction <maximumf>, %190, %cst_64 [0] : vector<8x32xf32> to vector<32xf32>
    %192 = vector.shape_cast %191 : vector<32xf32> to vector<1x32xf32>
    %193 = vector.extract_strided_slice %189 {offsets = [8, 0], sizes = [8, 32], strides = [1, 1]} : vector<16x32xf32> to vector<8x32xf32>
    %cst_65 = arith.constant dense<0xFF800000> : vector<32xf32>
    %194 = vector.multi_reduction <maximumf>, %193, %cst_65 [0] : vector<8x32xf32> to vector<32xf32>
    %195 = vector.shape_cast %194 : vector<32xf32> to vector<1x32xf32>
    %196 = tpu.concatenate %192, %195 in 0 : vector<1x32xf32>, vector<1x32xf32> -> vector<2x32xf32>
    %197 = arith.truncf %196 : vector<2x32xf32> to vector<2x32xbf16>
    %c240 = arith.constant 240 : index
    %c0_66 = arith.constant 0 : index
    %198 = vector.load %arg2[%c240, %c0_66] : memref<336x128xbf16, #tpu.memory_space<vmem>>, vector<32x64xbf16>
    %cst_67 = arith.constant dense<0.000000e+00> : vector<2x64xf32>
    %199 = tpu.matmul %197, %198, %cst_67 {dimension_numbers = #tpu.dot_dimension_numbers<[1], [0], [0], [1], [0, 0, 1, 1], [], []>} : vector<2x32xbf16>, vector<32x64xbf16>, vector<2x64xf32> -> vector<2x64xf32>
    %c12 = arith.constant 12 : index
    %c0_68 = arith.constant 0 : index
    %200 = vector.load %arg3[%c12, %c0_68] : memref<16x128xf32, #tpu.memory_space<vmem>>, vector<1x64xf32>
    %201 = vector.broadcast %200 : vector<1x64xf32> to vector<2x64xf32>
    %202 = arith.addf %199, %201 : vector<2x64xf32>
    %cst_69 = arith.constant 0.000000e+00 : f32
    %203 = vector.broadcast %cst_69 : f32 to vector<2x64xf32>
    %204 = arith.maximumf %202, %203 : vector<2x64xf32>
    %205 = arith.truncf %204 : vector<2x64xf32> to vector<2x64xbf16>
    %c272 = arith.constant 272 : index
    %c0_70 = arith.constant 0 : index
    %206 = vector.load %arg2[%c272, %c0_70] : memref<336x128xbf16, #tpu.memory_space<vmem>>, vector<64x5xbf16>
    %cst_71 = arith.constant dense<0.000000e+00> : vector<2x5xf32>
    %207 = tpu.matmul %205, %206, %cst_71 {dimension_numbers = #tpu.dot_dimension_numbers<[1], [0], [0], [1], [0, 0, 1, 1], [], []>} : vector<2x64xbf16>, vector<64x5xbf16>, vector<2x5xf32> -> vector<2x5xf32>
    %c13 = arith.constant 13 : index
    %c0_72 = arith.constant 0 : index
    %208 = vector.load %arg3[%c13, %c0_72] : memref<16x128xf32, #tpu.memory_space<vmem>>, vector<1x5xf32>
    %209 = vector.broadcast %208 : vector<1x5xf32> to vector<2x5xf32>
    %210 = arith.addf %207, %209 : vector<2x5xf32>
    %211 = vector.extract_strided_slice %210 {offsets = [0, 0], sizes = [2, 4], strides = [1, 1]} : vector<2x5xf32> to vector<2x4xf32>
    %212 = vector.extract_strided_slice %210 {offsets = [0, 4], sizes = [2, 1], strides = [1, 1]} : vector<2x5xf32> to vector<2x1xf32>
    %cst_73 = arith.constant dense<0xFF800000> : vector<2xf32>
    %213 = vector.multi_reduction <maximumf>, %211, %cst_73 [1] : vector<2x4xf32> to vector<2xf32>
    %214 = vector.shape_cast %213 : vector<2xf32> to vector<2x1xf32>
    %215 = vector.broadcast %214 : vector<2x1xf32> to vector<2x4xf32>
    %216 = arith.subf %211, %215 : vector<2x4xf32>
    %217 = math.exp %216 : vector<2x4xf32>
    %cst_74 = arith.constant dense<0.000000e+00> : vector<2xf32>
    %218 = vector.multi_reduction <add>, %217, %cst_74 [1] : vector<2x4xf32> to vector<2xf32>
    %219 = vector.shape_cast %218 : vector<2xf32> to vector<2x1xf32>
    %220 = vector.broadcast %219 : vector<2x1xf32> to vector<2x4xf32>
    %221 = arith.divf %217, %220 : vector<2x4xf32>
    %cst_75 = arith.constant 0.000000e+00 : f32
    %222 = vector.broadcast %cst_75 : f32 to vector<2x123xf32>
    %223 = tpu.concatenate %221, %212, %222 in 1 : vector<2x4xf32>, vector<2x1xf32>, vector<2x123xf32> -> vector<2x128xf32>
    %cst_76 = arith.constant 0.000000e+00 : f32
    %224 = vector.broadcast %cst_76 : f32 to vector<6x128xf32>
    %225 = tpu.concatenate %223, %224 in 0 : vector<2x128xf32>, vector<6x128xf32> -> vector<8x128xf32>
    %c0_77 = arith.constant 0 : index
    %c0_78 = arith.constant 0 : index
    %226 = vector.load %arg4[%c0_77, %c0_78] : memref<8x128xf32, #tpu.memory_space<vmem>>, vector<8x128xf32>
    tpu.vector_store %arg4[%c0_77, %c0_78], %225 {strides = array<i32>} : memref<8x128xf32, #tpu.memory_space<vmem>>, vector<8x128xf32>,
    return
  }
  func.func @transform_0(%arg0: i32) -> (i32, i32) {
    %c0_i32 = arith.constant 0 : i32
    %c0_i32_0 = arith.constant 0 : i32
    %c0_i32_1 = arith.constant 0 : i32
    return %c0_i32, %c0_i32_0 : i32, i32
  }
  func.func @transform_1(%arg0: i32) -> (i32, i32) {
    %c0_i32 = arith.constant 0 : i32
    %c0_i32_0 = arith.constant 0 : i32
    %c0_i32_1 = arith.constant 0 : i32
    return %c0_i32, %c0_i32_0 : i32, i32
  }
  func.func @transform_2(%arg0: i32) -> (i32, i32) {
    %c0_i32 = arith.constant 0 : i32
    %c0_i32_0 = arith.constant 0 : i32
    %c0_i32_1 = arith.constant 0 : i32
    return %c0_i32, %c0_i32_0 : i32, i32
  }
  func.func @transform_3(%arg0: i32) -> (i32, i32) {
    %c0_i32 = arith.constant 0 : i32
    %c0_i32_0 = arith.constant 0 : i32
    %c0_i32_1 = arith.constant 0 : i32
    return %c0_i32, %c0_i32_0 : i32, i32
  }
}

</mosaic_0001>

<bundles_post_ra>
// kernel: categorical_pg_forward.1
= control target key start
LH: loop header
LB: loop body
LE: loop exit
PB: predicated region body
PF: predicated region fallthrough
CT: control target
= control target key end

     0   :  { %vm49_vm0 = vcmask 1043456   ;;  %vm36_vm1 = vcmask 64512   ;;  %v1645_v3 = vmov 0.0   ;;  %vm1646_vm2 = vmmov 0   ;;  %s1647_s28 = smov 96   ;;  %s1648_s29 = smov 64   ;;  %s1934_s1 = inlined_call_operand.vmem [shape: bf16[336,128], index: 1, kind: input, shape index: {}]   ;;  %s1935_s0 = inlined_call_operand.vmem [shape: f32[64,8], index: 0, kind: input, shape index: {}]   ;;  %s1936_s2 = inlined_call_operand.vmem [shape: f32[16,128], index: 2, kind: input, shape index: {}]   ;;  %s1937_s3 = inlined_call_operand.vmem [shape: f32[8,128], index: 3, kind: output, shape index: {}]  }
   0x1   :  { %v31_v0 = vld [vmem:[%s1934_s1] sm:$0xf]  ;;  %v16_v2 = vld [vmem:[%s1935_s0 + $0x8] sm:$0xff]  ;;  %1454 = vmatprep.subr.bf16.mxu1 %v1645_v3  ;;  %1456 = vmatprep.mubr.msk.bf16.mxu1 %vm1646_vm2, %v1645_v3  ;;  %v17_v5 = vld [vmem:[%s1935_s0 + $0x10] sm:$0xff]  ;;  %vm191_vm3 = vcmask 261120   ;;  %vm731_vm6 = vcmask 130048  }
   0x2   :  { %v15_v1 = vld [vmem:[%s1935_s0] sm:$0xff]  ;;  %1586 = vmatprep.subr.msk.bf16.mxu0 %vm49_vm0, %v31_v0  ;;  %v51_v4 = vsel %vm49_vm0, %v31_v0, 0  ;;  %v18_v6 = vld [vmem:[%s1935_s0 + $0x18] sm:$0xff]  ;;  %v20_v9 = vld [vmem:[%s1935_s0 + $0x28] sm:$0xff]  ;;  %vm1049_vm8 = vcmask 523264   ;;  %vm1161_vm9 = vcmask 1040384  }
   0x3   :  { %v19_v7 = vld [vmem:[%s1935_s0 + $0x20] sm:$0xff]  ;;  %v32_v8 = vpack.c.bf16 %v16_v2, %v15_v1  ;;  %1445 = vmatpush3.bf16.msra.mxu0 %v51_v4  ;;  %v21_v10 = vld [vmem:[%s1935_s0 + $0x30] sm:$0xff]  ;;  %v22_v11 = vld [vmem:[%s1935_s0 + $0x38] sm:$0xff]  ;;  %v23_v12 = vadd.f32 %v17_v5, %v15_v1  ;;  %v24_v13 = vadd.f32 %v18_v6, %v16_v2  ;;  %v33_v14 = vpack.c.bf16 %v18_v6, %v17_v5 }
   0x4   :  { %1455 = vmatpush3.bf16.msra.mxu1 %v51_v4  ;;  %v34_v15 = vpack.c.bf16 %v20_v9, %v19_v7  ;;  %1468 = vmatprep.subr.bf16.mxu0 %v1645_v3  ;;  %v35_v22 = vpack.c.bf16 %v22_v11, %v21_v10  ;;  %v1601_v24 = vld [vmem:[%s1934_s1 + $0x8] sm:$0xff]   ;;  %v1602_v25 = vld [vmem:[%s1934_s1 + $0x10] sm:$0xff]   ;;  %v1338_v31 = vld [vmem:[%s1936_s2] ss:$0 sm:$0xff]  ;;  %vm1310_vm10 = vcmask 25600   ;;  %vm1322_vm11 = vcmask 31744  }
   0x5   :  { %1446 = vmatprep.mubr.msk.bf16.mxu0 %vm36_vm1, %v32_v8  ;;  %1460 = vmatprep.subr.bf16.mxu1 %v1645_v3  ;;  %v25_v16 = vadd.f32 %v23_v12, %v19_v7  ;;  %v26_v17 = vadd.f32 %v24_v13, %v20_v9  ;;  %v402_v4 = vld [vmem:[%s1934_s1 + $0x4] sm:$0xf]  ;;  %v1603_v6 = vld [vmem:[%s1934_s1 + $0x18] sm:$0xff]   ;;  %vm1577_vm4 = vmpackc.low %vm191_vm3, %vm191_vm3  ;;  %vm1324_vm12 = vcmask 39936   ;;  %vm1326_vm13 = vcmask 1041408  }
   0x6   :  { %1447 = vmatmul.mubr.msk.bf16.vlgmr.msra.gmra.mrb[0].mxu0 %vm36_vm1, %v33_v14  ;;  %v409_v5 = vsel %vm49_vm0, %v402_v4, 0  ;;  %v1604_v7 = vld [vmem:[%s1934_s1 + $0x20] sm:$0xff]  }
   0x7   :  { %v27_v18 = vadd.f32 %v25_v16, %v21_v10  ;;  %v28_v19 = vadd.f32 %v26_v17, %v22_v11  ;;  %1450 = vmatprep.mubr.msk.bf16.mxu0 %vm36_vm1, %v34_v15  ;;  %1469 = vmatpush3.bf16.msra.mxu0 %v1601_v24 }
   0x8   :  { %1470 = vmatprep.subr.bf16.mxu0 %v1645_v3 }
   0x9   :  { %v29_v20 = vmul.f32 0.25, %v27_v18  ;;  %v30_v21 = vmul.f32 0.25, %v28_v19 }
   0xb   :  { %v1706_v23 = vpack.c.bf16 %v30_v21, %v29_v20  ;;  %1471 = vmatpush3.bf16.msra.mxu0 %v1602_v25 }
   0xc   :  { %1484 = vmatprep.subr.bf16.mxu0 %v1645_v3 }
   0xd   :  { %1457 = vmatmul.mubr.msk.bf16.vlgmr.msra.gmra.mrb[0].mxu1 %vm36_vm1, %v1706_v23 }
   0xe   :  { %1451 = vmatmul.mubr.msk.bf16.gmra.mrb[4].mxu0 %vm36_vm1, %v35_v22  ;;  %1464 = vmatprep.mubr.msk.bf16.mxu1 %vm1646_vm2, %v1645_v3 }
   0xf   :  { %1472 = vmatprep.mubr.msk.bf16.mxu0 %vm1646_vm2, %v1645_v3  ;;  %1461 = vmatpush3.bf16.msra.mxu1 %v1601_v24 }
  0x10   :  { %1462 = vmatprep.subr.bf16.mxu1 %v1645_v3 }
  0x13   :  { %1463 = vmatpush3.bf16.msra.mxu1 %v1602_v25 }
  0x14   :  { %1476 = vmatprep.subr.bf16.mxu1 %v1645_v3 }
  0xd9   :  { %v1448_v26 = vpop.f32.mrb[0].mxu0 }
  0xda   :  { %v87_v27 = vpop.f32.mrb[1].mxu0 }
  0xdb   :  { %v1449_v28 = vpop.f32.mrb[2].mxu0 }
  0xdc   :  { %v90_v29 = vpop.f32.mrb[3].mxu0 }
  0xe0   :  { %v156_v30 = vpop.f32.mrb[0].mxu1 }
  0xe1   :  { %v168_v32 = vsub.f32 %v87_v27, %v156_v30  ;;  %v236_v33 = vsub.f32 %v1448_v26, %v156_v30  ;;  %v1458_v34 = vpop.f32.mrb[1].mxu1  ;;  %v1452_v35 = vpop.f32.mrb[4].mxu0 }
  0xe2   :  { %v342_v36 = vsub.f32 %v1452_v35, %v156_v30  ;;  %v159_v37 = vpop.f32.mrb[2].mxu1  ;;  %v103_v38 = vpop.f32.mrb[5].mxu0 }
  0xe3   :  { %v174_v39 = vadd.f32 %v1338_v31, %v168_v32  ;;  %v238_v40 = vadd.f32 %v1338_v31, %v236_v33  ;;  %v169_v41 = vsub.f32 %v90_v29, %v159_v37  ;;  %v237_v42 = vsub.f32 %v1449_v28, %v159_v37  ;;  %v1459_v43 = vpop.f32.mrb[3].mxu1  ;;  %v1453_v44 = vpop.f32.mrb[6].mxu0 }
  0xe4   :  { %v344_v45 = vadd.f32 %v1338_v31, %v342_v36  ;;  %v289_v46 = vsub.f32 %v103_v38, %v156_v30  ;;  %v343_v47 = vsub.f32 %v1453_v44, %v159_v37  ;;  %v106_v48 = vpop.f32.mrb[7].mxu0  ;;  %v1346_v30 = vld [vmem:[%s1936_s2 + $0x2] ss:$0 sm:$0xff] }
  0xe5   :  { %v175_v49 = vadd.f32 %v1338_v31, %v169_v41  ;;  %v239_v50 = vadd.f32 %v1338_v31, %v237_v42  ;;  %v290_v53 = vsub.f32 %v106_v48, %v159_v37  ;;  %v176_v54 = vmax.f32 %v174_v39, 0.0  ;;  %v1348_v41 = vld [vmem:[%s1936_s2 + $0x3] ss:$0 sm:$0xff] }
  0xe6   :  { %v291_v51 = vadd.f32 %v1338_v31, %v289_v46  ;;  %v345_v52 = vadd.f32 %v1338_v31, %v343_v47  ;;  %v240_v55 = vmax.f32 %v238_v40, 0.0  ;;  %v346_v58 = vmax.f32 %v344_v45, 0.0  ;;  %v1345_v40 = vld [vmem:[%s1936_s2 + $0x1] ss:$0 sm:$0xff] }
  0xe7   :  { %v177_v56 = vmax.f32 %v175_v49, 0.0  ;;  %v241_v57 = vmax.f32 %v239_v50, 0.0  ;;  %v292_v60 = vadd.f32 %v1338_v31, %v290_v53 }
  0xe8   :  { %v347_v59 = vmax.f32 %v345_v52, 0.0  ;;  %v293_v63 = vmax.f32 %v291_v51, 0.0 }
  0xe9   :  { %v178_v61 = vpack.c.bf16 %v177_v56, %v176_v54  ;;  %v242_v62 = vpack.c.bf16 %v241_v57, %v240_v55  ;;  %v294_v1 = vmax.f32 %v292_v60, 0.0 }
  0xea   :  { %v348_v0 = vpack.c.bf16 %v347_v59, %v346_v58  ;;  %v1605_v58 = vld [vmem:[%s1934_s1 + $0x28] sm:$0xff]   ;;  %v1606_v59 = vld [vmem:[%s1934_s1 + $0x30] sm:$0xff]  }
  0xeb   :  { %1465 = vmatmul.mubr.msk.bf16.vlgmr.msra.gmra.mrb[4].mxu1 %vm191_vm3, %v178_v61  ;;  %1473 = vmatmul.mubr.msk.bf16.vlgmr.msra.gmra.mrb[8].mxu0 %vm191_vm3, %v242_v62  ;;  %v295_v2 = vpack.c.bf16 %v294_v1, %v293_v63 }
  0xec   :  { %1477 = vmatpush3.bf16.msra.mxu1 %v1601_v24  ;;  %1485 = vmatpush3.bf16.msra.mxu0 %v1601_v24 }
  0xed   :  { %1478 = vmatprep.subr.bf16.mxu1 %v1645_v3  ;;  %1486 = vmatprep.subr.bf16.mxu0 %v1645_v3 }
  0xee   :  { %1480 = vmatprep.mubr.msk.bf16.mxu1 %vm1646_vm2, %v1645_v3  ;;  %1488 = vmatprep.mubr.msk.bf16.mxu0 %vm1646_vm2, %v1645_v3 }
  0xf0   :  { %1479 = vmatpush3.bf16.msra.mxu1 %v1602_v25  ;;  %1487 = vmatpush3.bf16.msra.mxu0 %v1602_v25 }
  0xf1   :  { %1492 = vmatprep.subr.bf16.mxu1 %v1645_v3  ;;  %1498 = vmatprep.subr.bf16.mxu0 %v1645_v3 }
  0xf3   :  { %1481 = vmatmul.mubr.msk.bf16.vlgmr.msra.gmra.mrb[8].mxu1 %vm191_vm3, %v295_v2  ;;  %1489 = vmatmul.mubr.msk.bf16.vlgmr.msra.gmra.mrb[12].mxu0 %vm191_vm3, %v348_v0 }
  0xf4   :  { %1493 = vmatpush3.bf16.msra.mxu1 %v409_v5  ;;  %1494 = vmatprep.mubr.msk.bf16.mxu1 %vm1646_vm2, %v1645_v3 }
  0xf5   :  { %1502 = vmatprep.mubr.msk.bf16.mxu0 %vm1646_vm2, %v1645_v3  ;;  %1506 = vmatprep.subr.bf16.mxu1 %v1645_v3 }
  0xf6   :  { %1499 = vmatpush3.bf16.msra.mxu0 %v1603_v6 }
  0xf7   :  { %1500 = vmatprep.subr.bf16.mxu0 %v1645_v3 }
  0xfa   :  { %1501 = vmatpush3.bf16.msra.mxu0 %v1604_v7 }
  0xfb   :  { %1495 = vmatmul.mubr.msk.bf16.vlgmr.msra.gmra.mrb[12].mxu1 %vm36_vm1, %v1706_v23 }
  0xfc   :  { %1510 = vmatprep.mubr.msk.bf16.mxu1 %vm1646_vm2, %v1645_v3  ;;  %1507 = vmatpush3.bf16.msra.mxu1 %v1605_v58 }
  0xfd   :  { %1508 = vmatprep.subr.bf16.mxu1 %v1645_v3 }
 0x100   :  { %1509 = vmatpush3.bf16.msra.mxu1 %v1606_v59 }
 0x101   :  { %1536 = vmatprep.subr.bf16.mxu1 %v1645_v3 }
 0x1be   :  { %v229_v8 = vpop.f32.mrb[4].mxu1  ;;  %v280_v9 = vpop.f32.mrb[8].mxu0 }
 0x1bf   :  { %v287_v10 = vmax.f32 %v229_v8, %v280_v9  ;;  %v1466_v11 = vpop.f32.mrb[5].mxu1  ;;  %v1474_v12 = vpop.f32.mrb[9].mxu0 }
 0x1c0   :  { %v232_v13 = vpop.f32.mrb[6].mxu1  ;;  %v283_v14 = vpop.f32.mrb[10].mxu0 }
 0x1c1   :  { %v288_v15 = vmax.f32 %v232_v13, %v283_v14  ;;  %v1467_v16 = vpop.f32.mrb[7].mxu1  ;;  %v1475_v17 = vpop.f32.mrb[11].mxu0  ;;  %v1352_v14 = vld [vmem:[%s1936_s2 + $0x4] ss:$0 sm:$0xff] }
 0x1c6   :  { %v333_v18 = vpop.f32.mrb[8].mxu1  ;;  %v386_v19 = vpop.f32.mrb[12].mxu0 }
 0x1c7   :  { %v340_v20 = vmax.f32 %v287_v10, %v333_v18  ;;  %v1482_v21 = vpop.f32.mrb[9].mxu1  ;;  %v1490_v22 = vpop.f32.mrb[13].mxu0 }
 0x1c8   :  { %v336_v23 = vpop.f32.mrb[10].mxu1  ;;  %v389_v24 = vpop.f32.mrb[14].mxu0 }
 0x1c9   :  { %v393_v25 = vmax.f32 %v340_v20, %v386_v19  ;;  %v341_v26 = vmax.f32 %v288_v15, %v336_v23  ;;  %v1483_v27 = vpop.f32.mrb[11].mxu1  ;;  %v1491_v28 = vpop.f32.mrb[15].mxu0  ;;  %v1353_v19 = vld [vmem:[%s1936_s2 + $0x5] ss:$0 sm:$0xff] }
 0x1cb   :  { %v394_v29 = vmax.f32 %v341_v26, %v389_v24  ;;  %v400_v43 = vadd.f32 %v1345_v40, %v393_v25 }
 0x1cd   :  { %v401_v47 = vadd.f32 %v1345_v40, %v394_v29 }
 0x1ce   :  { %v445_v31 = vpop.f32.mrb[12].mxu1 }
 0x1cf   :  { %v446_v32 = vadd.f32 %v1346_v30, %v445_v31  ;;  %v1496_v33 = vpop.f32.mrb[13].mxu1 }
 0x1d0   :  { %v448_v34 = vpop.f32.mrb[14].mxu1  ;;  %v719_v33 = vlaneseq }
 0x1d1   :  { %v449_v35 = vadd.f32 %v1346_v30, %v448_v34  ;;  %v1497_v36 = vpop.f32.mrb[15].mxu1  ;;  %v452_v37 = vmax.f32 %v446_v32, 0.0 }
 0x1d2   :  { %v720_v34 = vshrl.u32 %v719_v33, 7  ;;  %v723_v36 = vand.u32 127, %v719_v33 }
 0x1d3   :  { %v453_v38 = vmax.f32 %v449_v35, 0.0 }
 0x1d4   :  { %v721_v35 = vadd.s32 8, %v720_v34 }
 0x1d5   :  { %v454_v39 = vpack.c.bf16 %v453_v38, %v452_v37  ;;  %v726_v38 = vshra.s32 %v723_v36, 3 }
 0x1d6   :  { %v725_v37 = vshra.s32 %v721_v35, 3 }
 0x1d7   :  { %1503 = vmatmul.mubr.msk.bf16.vlgmr.msra.gmra.mrb[16].mxu0 %vm191_vm3, %v454_v39  ;;  %v724_v39 = vshra.s32 %v720_v34, 3 }
 0x1d8   :  { %vm728_vm5 = vcmp.eq.s32.totalorder %v725_v37, %v726_v38 }
 0x1d9   :  { %vm727_vm7 = vcmp.eq.s32.totalorder %v724_v39, %v726_v38 }
 0x2aa   :  { %v513_v42 = vpop.f32.mrb[16].mxu0 }
 0x2ab   :  { %v514_v44 = vadd.f32 %v1348_v41, %v513_v42  ;;  %v1504_v45 = vpop.f32.mrb[17].mxu0 }
 0x2ac   :  { %v516_v46 = vpop.f32.mrb[18].mxu0 }
 0x2ad   :  { %v1770_v48 = vadd.f32 %v514_v44, %v400_v43  ;;  %v517_v49 = vadd.f32 %v1348_v41, %v516_v46  ;;  %v1505_v50 = vpop.f32.mrb[19].mxu0 }
 0x2af   :  { %v1772_v51 = vadd.f32 %v517_v49, %v401_v47  ;;  %v524_v52 = vsel %vm191_vm3, %v1770_v48, 0.0  ;;  %v533_v53 = vmul.f32 %v1770_v48, %v1770_v48 }
 0x2b0   :  { %525 = vadd.xlane.f32.xlu0 %v524_v52 }
 0x2b1   :  { %v535_v54 = vsel %vm191_vm3, %v533_v53, 0.0  ;;  %v534_v55 = vmul.f32 %v1772_v51, %v1772_v51  ;;  %v527_v56 = vsel %vm191_vm3, %v1772_v51, 0.0 }
 0x2b2   :  { %536 = vadd.xlane.f32.xlu1 %v535_v54 }
 0x2b3   :  { %v538_v57 = vsel %vm191_vm3, %v534_v55, 0.0 }
 0x2b4   :  { %528 = vadd.xlane.f32.xlu0 %v527_v56 }
 0x2b6   :  { %539 = vadd.xlane.f32.xlu1 %v538_v57 }
 0x33d   :  { %v526_v60 = vpop.xlane.xlu0 %525 }
 0x33e   :  { %v531_v61 = vmul.f32 0.03125, %v526_v60 }
 0x33f   :  { %v537_v62 = vpop.xlane.xlu1 %536 }
 0x340   :  { %v543_v63 = vmul.f32 %v531_v61, %v531_v61  ;;  %v541_v0 = vmul.f32 0.03125, %v537_v62  ;;  %v547_v11 = vsub.f32 %v1770_v48, %v531_v61 }
 0x341   :  { %v529_v1 = vpop.xlane.xlu0 %528 }
 0x342   :  { %v545_v2 = vsub.f32 %v541_v0, %v543_v63  ;;  %v532_v4 = vmul.f32 0.03125, %v529_v1  ;;  %v1607_v0 = vld [vmem:[%s1934_s1 + $0x38] sm:$0xff]   ;;  %v1608_v1 = vld [vmem:[%s1934_s1 + $0x40] sm:$0xff]  }
 0x343   :  { %v540_v5 = vpop.xlane.xlu1 %539 }
 0x344   :  { %v549_v6 = vadd.f32 1e-05, %v545_v2  ;;  %v544_v7 = vmul.f32 %v532_v4, %v532_v4  ;;  %v542_v8 = vmul.f32 0.03125, %v540_v5  ;;  %v548_v15 = vsub.f32 %v1772_v51, %v532_v4 }
 0x346   :  { %1621 = vrsqrt.f32 %v549_v6  ;;  %v546_v9 = vsub.f32 %v542_v8, %v544_v7 }
 0x348   :  { %v550_v10 = vadd.f32 1e-05, %v546_v9 }
 0x34a   :  { %1623 = vrsqrt.f32 %v550_v10 }
 0x350   :  { %v1622_v12 = vpop.eup %1621 }
 0x351   :  { %v553_v13 = vmul.f32 %v1622_v12, %v547_v11 }
 0x353   :  { %v559_v18 = vmul.f32 %v1352_v14, %v553_v13 }
 0x354   :  { %v1624_v16 = vpop.eup %1623 }
 0x355   :  { %v554_v17 = vmul.f32 %v1624_v16, %v548_v15  ;;  %v565_v21 = vadd.f32 %v1353_v19, %v559_v18 }
 0x357   :  { %v560_v20 = vmul.f32 %v1352_v14, %v554_v17 }
 0x359   :  { %v566_v22 = vadd.f32 %v1353_v19, %v560_v20 }
 0x35b   :  { %v567_v23 = vpack.c.bf16 %v566_v22, %v565_v21  ;;  %v1609_v22 = vld [vmem:[%s1934_s1 + $0x48] sm:$0xff]  }
 0x35d   :  { %1511 = vmatmul.mubr.msk.bf16.vlgmr.msra.gmra.mrb[16].mxu1 %vm191_vm3, %v567_v23  ;;  %v1610_v23 = vld [vmem:[%s1934_s1 + $0x50] sm:$0xff]  }
 0x35e   :  { %1540 = vmatprep.mubr.msk.bf16.mxu1 %vm1646_vm2, %v1645_v3  ;;  %1537 = vmatpush3.bf16.msra.mxu1 %v1609_v22 }
 0x35f   :  { %1538 = vmatprep.subr.bf16.mxu1 %v1645_v3 }
 0x362   :  { %1539 = vmatpush3.bf16.msra.mxu1 %v1610_v23 }
 0x363   :  { %1556 = vmatprep.subr.bf16.mxu1 %v1645_v3 }
 0x430   :  { %v621_v24 = vpop.f32.mrb[16].mxu1 }
 0x431   :  { %v1512_v25 = vpop.f32.mrb[17].mxu1  ;;  %1518 = vmatprep.mubr.msk.f32.mxu0 %vm191_vm3, %v621_v24 }
 0x432   :  { %v624_v26 = vpop.f32.mrb[18].mxu1  ;;  %v1612_v25 = vld [vmem:[%s1934_s1 + $0x60] sm:$0xff]  }
 0x433   :  { %v1596_v27 = vpack.i.bf16 %v624_v26, %v621_v24  ;;  %v1513_v28 = vpop.f32.mrb[19].mxu1  ;;  %v1611_v24 = vld [vmem:[%s1934_s1 + $0x58] sm:$0xff]  }
 0x435   :  { %1592 = vrot.lane.b32.xlu0 %v1596_v27, %s1647_s28 }
 0x4a7   :  { %v1593_v29 = vpop.permute.xlu0 %1592 }
 0x4a8   :  { %v1595_v30 = vunpack.i.h.bf16 %v1593_v29  ;;  %v1594_v31 = vunpack.i.l.bf16 %v1593_v29 }
 0x4aa   :  { %v1576_v32 = vpack.c.bf16 %v1595_v30, %v1594_v31 }
 0x4ac   :  { %1578 = vmatprep.subr.msk.bf16.mxu0 %vm1577_vm4, %v1576_v32 }
 0x4ad   :  { %1581 = vmatpush3.bf16.xpose.msk.msra.mxu0 %vm1577_vm4, %v1576_v32 }
 0x4b4   :  { %1519 = vmatmul.mubr.msk.f32.vlgmr.msra.gmra.mrb[20].mxu0 %vm191_vm3, %v624_v26 }
 0x587   :  { %v1520_v40 = vpop.f32.mrb[20].mxu0 }
 0x588   :  { %v718_v41 = vmul.f32 0.17677669, %v1520_v40  ;;  %v708_v42 = vpop.f32.mrb[21].mxu0 }
 0x589   :  { %v717_v43 = vmul.f32 0.17677669, %v708_v42  ;;  %v1366_v42 = vld [vmem:[%s1936_s2 + $0x6] ss:$0 sm:$0xff] }
 0x58a   :  { %v730_v44 = vsel %vm728_vm5, %v718_v41, -1e+09 }
 0x58b   :  { %v735_v45 = vsel %vm731_vm6, %v730_v44, -inf  ;;  %v729_v46 = vsel %vm727_vm7, %v717_v43, -1e+09 }
 0x58c   :  { %736 = vmax.xlane.f32.xlu1 %v735_v45  ;;  %v732_v47 = vsel %vm731_vm6, %v729_v46, -inf }
 0x590   :  { %733 = vmax.xlane.f32.xlu1 %v732_v47 }
 0x5a1   :  { %1597 = vrot.lane.b32.xlu1 %v1596_v27, %s1648_s29 }
 0x619   :  { %v737_v49 = vpop.xlane.xlu1 %736 }
 0x61a   :  { %v739_v50 = vsub.f32 %v730_v44, %v737_v49  ;;  %v1367_v49 = vld [vmem:[%s1936_s2 + $0x7] ss:$0 sm:$0xff] }
 0x61c   :  { %v742_v52 = vmul.f32 1.442695, %v739_v50 }
 0x61d   :  { %v734_v53 = vpop.xlane.xlu1 %733 }
 0x61e   :  { %1625 = vpow2.f32 %v742_v52  ;;  %v738_v54 = vsub.f32 %v729_v46, %v734_v53 }
 0x620   :  { %v740_v55 = vmul.f32 1.442695, %v738_v54 }
 0x621   :  { %v1598_v56 = vpop.permute.xlu1 %1597 }
 0x622   :  { %1627 = vpow2.f32 %v740_v55  ;;  %v1600_v57 = vunpack.i.h.bf16 %v1598_v56  ;;  %v1599_v58 = vunpack.i.l.bf16 %v1598_v56  ;;  %v1613_v55 = vld [vmem:[%s1934_s1 + $0x68] sm:$0xff]   ;;  %v1614_v56 = vld [vmem:[%s1934_s1 + $0x70] sm:$0xff]  }
 0x624   :  { %v1582_v59 = vpack.c.bf16 %v1600_v57, %v1599_v58  ;;  %v1368_v57 = vld [vmem:[%s1936_s2 + $0xa] ss:$0 sm:$0xff] }
 0x626   :  { %1583 = vmatprep.subr.bf16.mxu0 %v1582_v59 }
 0x627   :  { %1585 = vmatpush3.bf16.msra.mxu0 %v1582_v59 }
 0x628   :  { %v1626_v60 = vpop.eup %1625  ;;  %1528 = vmatprep.subr.bf16.mxu0 %v1645_v3 }
 0x629   :  { %v747_v61 = vsel %vm731_vm6, %v1626_v60, 0.0 }
 0x62a   :  { %748 = vadd.xlane.f32.xlu1 %v747_v61 }
 0x62c   :  { %v1628_v62 = vpop.eup %1627 }
 0x62d   :  { %1525 = vmatprep.mubr.msk.f32.mxu0 %vm731_vm6, %v1628_v62  ;;  %v744_v63 = vsel %vm731_vm6, %v1628_v62, 0.0 }
 0x62e   :  { %745 = vadd.xlane.f32.xlu0 %v744_v63  ;;  %1526 = vmatmul.mubr.msk.f32.vlgmr.msra.gmra.mrb[22].mxu0 %vm731_vm6, %v1626_v60 }
 0x62f   :  { %1532 = vmatprep.mubr.msk.bf16.mxu0 %vm1646_vm2, %v1645_v3  ;;  %1529 = vmatpush3.bf16.msra.mxu0 %v1607_v0 }
 0x630   :  { %1530 = vmatprep.subr.bf16.mxu0 %v1645_v3 }
 0x633   :  { %1531 = vmatpush3.bf16.msra.mxu0 %v1608_v1 }
 0x634   :  { %1544 = vmatprep.subr.bf16.mxu0 %v1645_v3 }
 0x6b7   :  { %v749_v2 = vpop.xlane.xlu1 %748 }
 0x6b8   :  { %1629 = vrcp.f32 %v749_v2 }
 0x6bb   :  { %v746_v4 = vpop.xlane.xlu0 %745 }
 0x6bc   :  { %1631 = vrcp.f32 %v746_v4 }
 0x6c2   :  { %v1630_v5 = vpop.eup %1629 }
 0x6c6   :  { %v1632_v7 = vpop.eup %1631 }
 0x701   :  { %v1527_v6 = vpop.f32.mrb[22].mxu0 }
 0x702   :  { %v840_v8 = vmul.f32 %v1630_v5, %v1527_v6  ;;  %v830_v9 = vpop.f32.mrb[23].mxu0  ;;  %v1377_v5 = vld [vmem:[%s1936_s2 + $0xb] ss:$0 sm:$0xff] }
 0x703   :  { %v839_v10 = vmul.f32 %v1632_v7, %v830_v9 }
 0x705   :  { %v841_v11 = vpack.c.bf16 %v840_v8, %v839_v10 }
 0x707   :  { %1533 = vmatmul.mubr.msk.bf16.vlgmr.msra.gmra.mrb[24].mxu0 %vm191_vm3, %v841_v11 }
 0x708   :  { %1552 = vmatprep.mubr.msk.bf16.mxu0 %vm1646_vm2, %v1645_v3  ;;  %1545 = vmatpush3.bf16.msra.mxu0 %v1611_v24 }
 0x709   :  { %1546 = vmatprep.subr.bf16.mxu0 %v1645_v3 }
 0x70c   :  { %1547 = vmatpush3.bf16.msra.mxu0 %v1612_v25 }
 0x70d   :  { %1548 = vmatprep.subr.bf16.mxu0 %v1645_v3 }
 0x710   :  { %1549 = vmatpush3.bf16.msra.mxu0 %v1613_v55 }
 0x711   :  { %1550 = vmatprep.subr.bf16.mxu0 %v1645_v3 }
 0x714   :  { %1551 = vmatpush3.bf16.msra.mxu0 %v1614_v56 }
 0x7da   :  { %v895_v12 = vpop.f32.mrb[24].mxu0 }
 0x7db   :  { %v1828_v13 = vadd.f32 %v895_v12, %v1770_v48  ;;  %v1534_v14 = vpop.f32.mrb[25].mxu0 }
 0x7dc   :  { %v898_v15 = vpop.f32.mrb[26].mxu0 }
 0x7dd   :  { %v1831_v16 = vadd.f32 %v898_v15, %v1772_v51  ;;  %v1535_v17 = vpop.f32.mrb[27].mxu0  ;;  %v906_v18 = vsel %vm191_vm3, %v1828_v13, 0.0  ;;  %v914_v48 = vmul.f32 %v1828_v13, %v1828_v13 }
 0x7de   :  { %907 = vadd.xlane.f32.xlu0 %v906_v18 }
 0x7df   :  { %v915_v19 = vmul.f32 %v1831_v16, %v1831_v16  ;;  %v909_v21 = vsel %vm191_vm3, %v1831_v16, 0.0  ;;  %v916_v51 = vsel %vm191_vm3, %v914_v48, 0.0 }
 0x7e1   :  { %v919_v20 = vsel %vm191_vm3, %v915_v19, 0.0 }
 0x7e2   :  { %920 = vadd.xlane.f32.xlu1 %v919_v20  ;;  %910 = vadd.xlane.f32.xlu0 %v909_v21  ;;  %v1616_v20 = vld [vmem:[%s1934_s1 + $0x80] sm:$0xff]  }
 0x7e6   :  { %917 = vadd.xlane.f32.xlu0 %v916_v51 }
 0x86b   :  { %v908_v26 = vpop.xlane.xlu0 %907 }
 0x86c   :  { %v912_v29 = vmul.f32 0.03125, %v908_v26 }
 0x86e   :  { %v924_v34 = vmul.f32 %v912_v29, %v912_v29  ;;  %v928_v43 = vsub.f32 %v1828_v13, %v912_v29 }
 0x86f   :  { %v921_v27 = vpop.xlane.xlu1 %920  ;;  %v911_v28 = vpop.xlane.xlu0 %910 }
 0x870   :  { %v913_v30 = vmul.f32 0.03125, %v911_v28  ;;  %v923_v31 = vmul.f32 0.03125, %v921_v27 }
 0x872   :  { %v925_v32 = vmul.f32 %v913_v30, %v913_v30  ;;  %v929_v40 = vsub.f32 %v1831_v16, %v913_v30 }
 0x873   :  { %v918_v33 = vpop.xlane.xlu0 %917 }
 0x874   :  { %v927_v35 = vsub.f32 %v923_v31, %v925_v32  ;;  %v922_v36 = vmul.f32 0.03125, %v918_v33 }
 0x876   :  { %v931_v37 = vadd.f32 1e-05, %v927_v35  ;;  %v926_v38 = vsub.f32 %v922_v36, %v924_v34  ;;  %v1378_v35 = vld [vmem:[%s1936_s2 + $0x8] ss:$0 sm:$0xff] }
 0x878   :  { %1633 = vrsqrt.f32 %v931_v37  ;;  %v930_v39 = vadd.f32 1e-05, %v926_v38 }
 0x87a   :  { %1635 = vrsqrt.f32 %v930_v39  ;;  %v1379_v39 = vld [vmem:[%s1936_s2 + $0x9] ss:$0 sm:$0xff] }
 0x882   :  { %v1634_v41 = vpop.eup %1633 }
 0x883   :  { %v935_v44 = vmul.f32 %v1634_v41, %v929_v40 }
 0x884   :  { %v1636_v45 = vpop.eup %1635 }
 0x885   :  { %v941_v46 = vmul.f32 %v1366_v42, %v935_v44  ;;  %v934_v47 = vmul.f32 %v1636_v45, %v928_v43 }
 0x887   :  { %v940_v50 = vmul.f32 %v1366_v42, %v934_v47  ;;  %v947_v52 = vadd.f32 %v1367_v49, %v941_v46 }
 0x889   :  { %v946_v53 = vadd.f32 %v1367_v49, %v940_v50 }
 0x88b   :  { %v948_v54 = vpack.c.bf16 %v947_v52, %v946_v53 }
 0x88d   :  { %1541 = vmatmul.mubr.msk.bf16.vlgmr.msra.gmra.mrb[20].mxu1 %vm191_vm3, %v948_v54 }
 0x88e   :  { %1560 = vmatprep.mubr.msk.bf16.mxu1 %vm1646_vm2, %v1645_v3 }
 0x960   :  { %v1007_v58 = vpop.f32.mrb[20].mxu1 }
 0x961   :  { %v1008_v59 = vadd.f32 %v1368_v57, %v1007_v58  ;;  %v1542_v60 = vpop.f32.mrb[21].mxu1 }
 0x962   :  { %v1010_v61 = vpop.f32.mrb[22].mxu1 }
 0x963   :  { %v1011_v62 = vadd.f32 %v1368_v57, %v1010_v61  ;;  %v1543_v63 = vpop.f32.mrb[23].mxu1  ;;  %v1014_v0 = vmax.f32 %v1008_v59, 0.0 }
 0x965   :  { %v1015_v1 = vmax.f32 %v1011_v62, 0.0  ;;  %v1617_v62 = vld [vmem:[%s1934_s1 + $0x88] sm:$0xff]  }
 0x967   :  { %v1016_v2 = vpack.c.bf16 %v1015_v1, %v1014_v0  ;;  %v1618_v0 = vld [vmem:[%s1934_s1 + $0x90] sm:$0xff]   ;;  %v1619_v1 = vld [vmem:[%s1934_s1 + $0x98] sm:$0xff]  }
 0x969   :  { %1553 = vmatmul.mubr.msk.bf16.vlgmr.msra.gmra.mrb[28].mxu0 %vm1049_vm8, %v1016_v2  ;;  %v1620_v2 = vld [vmem:[%s1934_s1 + $0xa0] sm:$0xff]  }
 0xa3c   :  { %v1087_v4 = vpop.f32.mrb[28].mxu0 }
 0xa3d   :  { %v1094_v6 = vadd.f32 %v1087_v4, %v1828_v13  ;;  %v1554_v7 = vpop.f32.mrb[29].mxu0  ;;  %v1380_v4 = vld [vmem:[%s1936_s2 + $0xc] ss:$0 sm:$0xff] }
 0xa3e   :  { %v1090_v8 = vpop.f32.mrb[30].mxu0 }
 0xa3f   :  { %v1101_v9 = vadd.f32 %v1377_v5, %v1094_v6  ;;  %v1095_v10 = vadd.f32 %v1090_v8, %v1831_v16  ;;  %v1555_v11 = vpop.f32.mrb[31].mxu0  ;;  %v1615_v16 = vld [vmem:[%s1934_s1 + $0x78] sm:$0xff]  }
 0xa40   :  { %1557 = vmatpush3.bf16.msra.mxu1 %v1615_v16 }
 0xa41   :  { %v1102_v12 = vadd.f32 %v1377_v5, %v1095_v10  ;;  %v1105_v14 = vsel %vm191_vm3, %v1101_v9, 0.0  ;;  %v1113_v15 = vmul.f32 %v1101_v9, %v1101_v9  ;;  %1558 = vmatprep.subr.bf16.mxu1 %v1645_v3 }
 0xa42   :  { %1106 = vadd.xlane.f32.xlu0 %v1105_v14 }
 0xa43   :  { %v1108_v17 = vsel %vm191_vm3, %v1102_v12, 0.0  ;;  %v1114_v18 = vmul.f32 %v1102_v12, %v1102_v12  ;;  %v1115_v19 = vsel %vm191_vm3, %v1113_v15, 0.0 }
 0xa44   :  { %1109 = vadd.xlane.f32.xlu1 %v1108_v17  ;;  %1559 = vmatpush3.bf16.msra.mxu1 %v1616_v20 }
 0xa45   :  { %v1118_v13 = vsel %vm191_vm3, %v1114_v18, 0.0  ;;  %1564 = vmatprep.subr.bf16.mxu1 %v1645_v3 }
 0xa46   :  { %1116 = vadd.xlane.f32.xlu0 %v1115_v19 }
 0xa48   :  { %1119 = vadd.xlane.f32.xlu1 %v1118_v13 }
 0xacf   :  { %v1107_v21 = vpop.xlane.xlu0 %1106 }
 0xad0   :  { %v1111_v48 = vmul.f32 0.03125, %v1107_v21 }
 0xad1   :  { %v1110_v51 = vpop.xlane.xlu1 %1109 }
 0xad2   :  { %v1112_v22 = vmul.f32 0.03125, %v1110_v51  ;;  %v1123_v24 = vmul.f32 %v1111_v48, %v1111_v48  ;;  %v1127_v33 = vsub.f32 %v1101_v9, %v1111_v48 }
 0xad3   :  { %v1117_v23 = vpop.xlane.xlu0 %1116 }
 0xad4   :  { %v1121_v25 = vmul.f32 0.03125, %v1117_v23  ;;  %v1124_v27 = vmul.f32 %v1112_v22, %v1112_v22  ;;  %v1128_v36 = vsub.f32 %v1102_v12, %v1112_v22 }
 0xad5   :  { %v1120_v26 = vpop.xlane.xlu1 %1119 }
 0xad6   :  { %v1125_v28 = vsub.f32 %v1121_v25, %v1123_v24  ;;  %v1122_v29 = vmul.f32 0.03125, %v1120_v26 }
 0xad8   :  { %v1129_v30 = vadd.f32 1e-05, %v1125_v28  ;;  %v1126_v31 = vsub.f32 %v1122_v29, %v1124_v27 }
 0xada   :  { %1637 = vrsqrt.f32 %v1129_v30  ;;  %v1130_v32 = vadd.f32 1e-05, %v1126_v31 }
 0xadc   :  { %1639 = vrsqrt.f32 %v1130_v32 }
 0xae4   :  { %v1638_v34 = vpop.eup %1637 }
 0xae5   :  { %v1133_v37 = vmul.f32 %v1638_v34, %v1127_v33 }
 0xae6   :  { %v1640_v38 = vpop.eup %1639 }
 0xae7   :  { %v1139_v40 = vmul.f32 %v1378_v35, %v1133_v37  ;;  %v1134_v41 = vmul.f32 %v1640_v38, %v1128_v36 }
 0xae9   :  { %v1145_v42 = vadd.f32 %v1379_v39, %v1139_v40  ;;  %v1140_v43 = vmul.f32 %v1378_v35, %v1134_v41 }
 0xaeb   :  { %v1147_v44 = vsel %vm191_vm3, %v1145_v42, -inf  ;;  %v1146_v45 = vadd.f32 %v1379_v39, %v1140_v43 }
 0xaec   :  { %v1148_v46 = vrot.slane %v1147_v44, 4 }
 0xaed   :  { %v1154_v47 = vsel %vm191_vm3, %v1146_v45, -inf }
 0xaee   :  { %v1155_v49 = vrot.slane %v1154_v47, 4  ;;  %v1149_v50 = vmax.f32 %v1147_v44, %v1148_v46 }
 0xaf0   :  { %v1150_v52 = vrot.slane %v1149_v50, 2  ;;  %v1156_v53 = vmax.f32 %v1154_v47, %v1155_v49 }
 0xaf2   :  { %v1151_v54 = vmax.f32 %v1149_v50, %v1150_v52  ;;  %v1157_v55 = vrot.slane %v1156_v53, 2 }
 0xaf4   :  { %v1152_v56 = vrot.slane %v1151_v54, 1  ;;  %v1158_v57 = vmax.f32 %v1156_v53, %v1157_v55 }
 0xaf6   :  { %v1159_v58 = vrot.slane %v1158_v57, 1  ;;  %v1153_v59 = vmax.f32 %v1151_v54, %v1152_v56 }
 0xaf8   :  { %v1160_v60 = vmax.f32 %v1158_v57, %v1159_v58 }
 0xafa   :  { %v1162_v61 = vsel %vm1161_vm9, %v1153_v59, %v1160_v60 }
 0xafb   :  { %v1163_v63 = vpack.c.bf16 %v1162_v61, %v1162_v61 }
 0xafd   :  { %1561 = vmatmul.mubr.msk.bf16.vlgmr.msra.gmra.mrb[24].mxu1 %vm191_vm3, %v1163_v63 }
 0xafe   :  { %1565 = vmatpush3.bf16.msra.mxu1 %v1617_v62  ;;  %1572 = vmatprep.mubr.msk.bf16.mxu1 %vm1646_vm2, %v1645_v3 }
 0xaff   :  { %1566 = vmatprep.subr.bf16.mxu1 %v1645_v3 }
 0xb02   :  { %1567 = vmatpush3.bf16.msra.mxu1 %v1618_v0 }
 0xb03   :  { %1568 = vmatprep.subr.bf16.mxu1 %v1645_v3 }
 0xb06   :  { %1569 = vmatpush3.bf16.msra.mxu1 %v1619_v1 }
 0xb07   :  { %1570 = vmatprep.subr.bf16.mxu1 %v1645_v3  ;;  %v1384_v3 = vld [vmem:[%s1936_s2 + $0xd] ss:$0 sm:$0xff] }
 0xb0a   :  { %1571 = vmatpush3.bf16.msra.mxu1 %v1620_v2 }
 0xbd0   :  { %v1222_v5 = vpop.f32.mrb[24].mxu1 }
 0xbd1   :  { %v1223_v6 = vadd.f32 %v1380_v4, %v1222_v5  ;;  %v1562_v7 = vpop.f32.mrb[25].mxu1 }
 0xbd2   :  { %v1225_v8 = vpop.f32.mrb[26].mxu1 }
 0xbd3   :  { %v1228_v9 = vmax.f32 %v1223_v6, 0.0  ;;  %v1563_v10 = vpop.f32.mrb[27].mxu1 }
 0xbd5   :  { %v1229_v11 = vpack.c.bf16 %v1228_v9, %v1228_v9 }
 0xbd7   :  { %1573 = vmatmul.mubr.msk.bf16.vlgmr.msra.gmra.mrb[28].mxu1 %vm1049_vm8, %v1229_v11 }
 0xcaa   :  { %v1304_v12 = vpop.f32.mrb[28].mxu1 }
 0xcab   :  { %v1305_v14 = vadd.f32 %v1384_v3, %v1304_v12  ;;  %v1574_v15 = vpop.f32.mrb[29].mxu1 }
 0xcac   :  { %v1307_v17 = vpop.f32.mrb[30].mxu1 }
 0xcad   :  { %v1575_v18 = vpop.f32.mrb[31].mxu1  ;;  %v1311_v19 = vsel %vm1310_vm10, %v1305_v14, -inf }
 0xcae   :  { %1312 = vmax.xlane.f32.xlu0 %v1311_v19 }
 0xd3b   :  { %v1313_v13 = vpop.xlane.xlu0 %1312 }
 0xd3c   :  { %v1314_v16 = vsub.f32 %v1305_v14, %v1313_v13 }
 0xd3e   :  { %v1315_v20 = vmul.f32 1.442695, %v1314_v16 }
 0xd40   :  { %1641 = vpow2.f32 %v1315_v20 }
 0xd4a   :  { %v1642_v21 = vpop.eup %1641 }
 0xd4b   :  { %v1317_v48 = vsel %vm1310_vm10, %v1642_v21, 0.0 }
 0xd4c   :  { %1318 = vadd.xlane.f32.xlu1 %v1317_v48 }
 0xdd9   :  { %v1319_v51 = vpop.xlane.xlu1 %1318 }
 0xdda   :  { %1643 = vrcp.f32 %v1319_v51 }
 0xde4   :  { %v1644_v22 = vpop.eup %1643 }
 0xde5   :  { %v1321_v23 = vmul.f32 %v1644_v22, %v1642_v21 }
 0xde7   :  { %v1323_v24 = vsel %vm1322_vm11, %v1321_v23, %v1305_v14 }
 0xde8   :  { %v1325_v25 = vsel %vm1324_vm12, %v1323_v24, 0.0 }
 0xde9   :  { %v1327_v26 = vsel %vm1326_vm13, %v1325_v25, 0.0 }
 0xdea   :  { %1328 = vst [vmem:[%s1937_s3] sm:$0xff] %v1327_v26 }

</bundles_post_ra>
